<compile_context>
chip_gen: v7x
topology: tpu7x:2x2x1
jax: 0.10.0
libtpu: 0.0.40
codegen_flags: <defaults>
</compile_context>

<pallas_src>
import jax
import jax.numpy as jnp
from jax import lax
from jax.experimental import pallas as pl
from jax.experimental.pallas import tpu as pltpu


def _round_up(x, m):
    return ((x + m - 1) // m) * m


def _pick_tile_rows(L, M, *, max_rows=1024, vmem_budget_bytes=24 << 20):
    """Largest tile (multiple of 8) whose working set fits a conservative VMEM
    budget: ~11 tile-sized f32 buffers (2x3 double-buffered inputs + temps).
    The 24 MiB budget stays under the 32 MiB scoped default on v5e/v6e/v7x."""
    rows_by_vmem = vmem_budget_bytes // (11 * 4 * max(M, 1))
    rows = max(8, min(rows_by_vmem, max_rows, _round_up(L, 8)))
    return _round_up(rows, 8)


def _ic_kernel(x_ref, y_ref, w_ref, wic_ref, ric_ref):
    x = x_ref[...].astype(jnp.float32)   # (tile_rows, M)
    y = y_ref[...].astype(jnp.float32)
    w = w_ref[...].astype(jnp.float32)
    m = jnp.float32(x.shape[1])

    def rsum(a):
        return jnp.sum(a, axis=1, keepdims=True)   # lane reduction -> (T, 1)

    # single-pass fused moment sums
    xy = x * y
    wx = w * x
    wy = w * y
    s_w = rsum(w)
    s_wx = rsum(wx)
    s_wy = rsum(wy)
    s_wxy = rsum(w * xy)
    s_wxx = rsum(wx * x)
    s_wyy = rsum(wy * y)
    s_x = rsum(x)
    s_y = rsum(y)
    s_xy = rsum(xy)
    s_xx = rsum(x * x)
    s_yy = rsum(y * y)

    # ---- weighted IC (get_weakfactor_IC, weight is not None) ---------------
    # torch: X_mean = sum(w*x), y_mean = sum(w*y)  (weights assumed to sum ~1)
    xm, ym = s_wx, s_wy
    num_w = s_wxy - xm * s_wy - ym * s_wx + xm * ym * s_w
    var_xw = s_wxx - 2.0 * xm * s_wx + xm * xm * s_w
    var_yw = s_wyy - 2.0 * ym * s_wy + ym * ym * s_w
    wic_ref[...] = num_w * lax.rsqrt(var_xw * var_yw)

    # ---- real IC (get_pred_real_IC, single prediction column) --------------
    f = (m - 1.0) / m
    mx = s_x / m
    my = s_y / m
    num_r = (s_xy - m * mx * my) / m
    var_x = (s_xx - m * mx * mx) / (m - 1.0)     # unbiased
    var_y = (s_yy - m * my * my) / (m - 1.0)
    denom = jnp.sqrt(var_x * var_y) * f
    ric_ref[...] = num_r / denom


def get_ic_vol(batch_X, batch_y, batch_w, *, tile_rows=None):
    """Pallas implementation of get_IC_vol.forward.

    Inputs are the stacked per-period tensors (the torch module takes python
    lists of (M, 1) tensors): shapes (L, M) or (L, M, 1).
    Returns (weightIC, weightICvol, realIC, realICvol), each of shape (1,).
    """
    def _as_2d(a):
        a = jnp.asarray(a, jnp.float32)
        if a.ndim == 3:
            a = a.reshape(a.shape[0], a.shape[1])
        return a

    x = _as_2d(batch_X)
    y = _as_2d(batch_y)
    w = _as_2d(batch_w)
    L, M = x.shape

    if tile_rows is None:
        tile_rows = _pick_tile_rows(L, M)
    num_tiles = pl.cdiv(L, tile_rows)
    L_pad = num_tiles * tile_rows   # only the (tiny) outputs are padded

    in_spec = pl.BlockSpec((tile_rows, M), lambda i: (i, 0))
    out_spec = pl.BlockSpec((tile_rows, 1), lambda i: (i, 0))

    wic, ric = pl.pallas_call(
        _ic_kernel,
        out_shape=(jax.ShapeDtypeStruct((L_pad, 1), jnp.float32),
                   jax.ShapeDtypeStruct((L_pad, 1), jnp.float32)),
        grid=(num_tiles,),
        in_specs=[in_spec, in_spec, in_spec],
        out_specs=(out_spec, out_spec),
        compiler_params=pltpu.CompilerParams(
            dimension_semantics=("parallel",)),
    )(x, y, w)

    # rows >= L are garbage from the ragged last block; drop them, then do the
    # tiny mean/std(ddof=1) over L two-pass in plain JAX (numerically safe).
    w_all = wic[:L, 0]
    r_all = ric[:L, 0]
    weightIC = jnp.mean(w_all, keepdims=True)
    weightICvol = jnp.std(w_all, ddof=1, keepdims=True)
    realIC = jnp.mean(r_all, keepdims=True)
    realICvol = jnp.std(r_all, ddof=1, keepdims=True)
    return weightIC, weightICvol, realIC, realICvol


def _reference(batch_X, batch_y, batch_w):
    """Plain-JAX reference mirroring the torch module exactly."""
    L = batch_X.shape[0]
    w_ics, r_ics = [], []
    for i in range(L):
        X = jnp.asarray(batch_X[i], jnp.float32).reshape(-1, 1)
        y = jnp.asarray(batch_y[i], jnp.float32).reshape(-1, 1)
        w = jnp.asarray(batch_w[i], jnp.float32).reshape(-1, 1)
        M = X.shape[0]
        # weighted IC
        X_mean = jnp.sum(X * w)
        y_mean = jnp.sum(y * w)
        Xr = X - X_mean
        yr = y - y_mean
        num = jnp.sum(w * Xr * yr)
        var_X = jnp.sum(w * Xr * Xr)
        var_y = jnp.sum(w * yr * yr)
        w_ics.append(num / jnp.sqrt(var_X * var_y))
        # real IC
        f = (M - 1) / M
        Xc = X - jnp.mean(X, axis=0)
        yc = y - jnp.mean(y)
        numerator = (Xc.T @ yc) / M
        vX = jnp.var(X, axis=0, ddof=1).reshape(X.shape[1], 1)
        vy = jnp.var(y, axis=0, ddof=1)
        denom = jnp.sqrt(vX.T * vy) * f
        r_ics.append((numerator / denom)[0, 0])
    w_arr = jnp.stack(w_ics)
    r_arr = jnp.stack(r_ics)
    return (w_arr.mean(), w_arr.std(ddof=1), r_arr.mean(), r_arr.std(ddof=1))


if __name__ == "__main__":
    key = jax.random.PRNGKey(0)
    kx, ky, kw = jax.random.split(key, 3)

    # small shapes consistent with the module: list_len=10 cross-sections,
    # 256 stocks per cross-section, single prediction / return column.
    L, M = 10, 256
    batch_X = jax.random.normal(kx, (L, M, 1), dtype=jnp.float32)
    # returns mildly correlated with the prediction, plus noise
    batch_y = (0.05 * batch_X
               + 0.1 * jax.random.normal(ky, (L, M, 1), dtype=jnp.float32))
    raw_w = jax.random.uniform(kw, (L, M, 1), dtype=jnp.float32,
                               minval=0.5, maxval=1.5)
    batch_w = raw_w / jnp.sum(raw_w, axis=1, keepdims=True)  # weights sum to 1

    w_ic, w_vol, r_ic, r_vol = get_ic_vol(batch_X, batch_y, batch_w)
    w_ic = jax.block_until_ready(w_ic)
    w_vol = jax.block_until_ready(w_vol)
    r_ic = jax.block_until_ready(r_ic)
    r_vol = jax.block_until_ready(r_vol)

    ref = jax.block_until_ready(_reference(batch_X, batch_y, batch_w))
    got = (w_ic[0], w_vol[0], r_ic[0], r_vol[0])
    for g, r in zip(got, ref):
        assert jnp.allclose(g, r, rtol=1e-4, atol=1e-5), (got, ref)

    print("KERNEL_OK")
</pallas_src>

<mosaic_0001>
module attributes {stable_mosaic.version = 11 : i64} {
  func.func @_ic_kernel(%arg0: i32, %arg1: memref<16x256xf32, #tpu.memory_space<vmem>>, %arg2: memref<16x256xf32, #tpu.memory_space<vmem>>, %arg3: memref<16x256xf32, #tpu.memory_space<vmem>>, %arg4: memref<16x1xf32, #tpu.memory_space<vmem>>, %arg5: memref<16x1xf32, #tpu.memory_space<vmem>>) attributes {dimension_semantics = [#tpu.dimension_semantics<parallel>], iteration_bounds = array<i64: 1>, scalar_prefetch = 0 : i64, scratch_operands = 0 : i64, tpu.core_type = #tpu.core_type<tc>, window_params = [{transform_indices = @transform_0, window_bounds = array<i64: 16, 256>}, {transform_indices = @transform_1, window_bounds = array<i64: 16, 256>}, {transform_indices = @transform_2, window_bounds = array<i64: 16, 256>}, {transform_indices = @transform_3, window_bounds = array<i64: 16, 1>}, {transform_indices = @transform_4, window_bounds = array<i64: 16, 1>}]} {
    %c0 = arith.constant 0 : index
    %c0_0 = arith.constant 0 : index
    %0 = vector.load %arg1[%c0, %c0_0] : memref<16x256xf32, #tpu.memory_space<vmem>>, vector<16x256xf32>
    %c0_1 = arith.constant 0 : index
    %c0_2 = arith.constant 0 : index
    %1 = vector.load %arg2[%c0_1, %c0_2] : memref<16x256xf32, #tpu.memory_space<vmem>>, vector<16x256xf32>
    %c0_3 = arith.constant 0 : index
    %c0_4 = arith.constant 0 : index
    %2 = vector.load %arg3[%c0_3, %c0_4] : memref<16x256xf32, #tpu.memory_space<vmem>>, vector<16x256xf32>
    %3 = arith.mulf %0, %1 : vector<16x256xf32>
    %4 = arith.mulf %2, %0 : vector<16x256xf32>
    %5 = arith.mulf %2, %1 : vector<16x256xf32>
    %cst = arith.constant dense<0.000000e+00> : vector<16xf32>
    %6 = vector.multi_reduction <add>, %2, %cst [1] : vector<16x256xf32> to vector<16xf32>
    %7 = vector.shape_cast %6 : vector<16xf32> to vector<16x1xf32>
    %cst_5 = arith.constant dense<0.000000e+00> : vector<16xf32>
    %8 = vector.multi_reduction <add>, %4, %cst_5 [1] : vector<16x256xf32> to vector<16xf32>
    %9 = vector.shape_cast %8 : vector<16xf32> to vector<16x1xf32>
    %cst_6 = arith.constant dense<0.000000e+00> : vector<16xf32>
    %10 = vector.multi_reduction <add>, %5, %cst_6 [1] : vector<16x256xf32> to vector<16xf32>
    %11 = vector.shape_cast %10 : vector<16xf32> to vector<16x1xf32>
    %12 = arith.mulf %2, %3 : vector<16x256xf32>
    %cst_7 = arith.constant dense<0.000000e+00> : vector<16xf32>
    %13 = vector.multi_reduction <add>, %12, %cst_7 [1] : vector<16x256xf32> to vector<16xf32>
    %14 = vector.shape_cast %13 : vector<16xf32> to vector<16x1xf32>
    %15 = arith.mulf %4, %0 : vector<16x256xf32>
    %cst_8 = arith.constant dense<0.000000e+00> : vector<16xf32>
    %16 = vector.multi_reduction <add>, %15, %cst_8 [1] : vector<16x256xf32> to vector<16xf32>
    %17 = vector.shape_cast %16 : vector<16xf32> to vector<16x1xf32>
    %18 = arith.mulf %5, %1 : vector<16x256xf32>
    %cst_9 = arith.constant dense<0.000000e+00> : vector<16xf32>
    %19 = vector.multi_reduction <add>, %18, %cst_9 [1] : vector<16x256xf32> to vector<16xf32>
    %20 = vector.shape_cast %19 : vector<16xf32> to vector<16x1xf32>
    %cst_10 = arith.constant dense<0.000000e+00> : vector<16xf32>
    %21 = vector.multi_reduction <add>, %0, %cst_10 [1] : vector<16x256xf32> to vector<16xf32>
    %22 = vector.shape_cast %21 : vector<16xf32> to vector<16x1xf32>
    %cst_11 = arith.constant dense<0.000000e+00> : vector<16xf32>
    %23 = vector.multi_reduction <add>, %1, %cst_11 [1] : vector<16x256xf32> to vector<16xf32>
    %24 = vector.shape_cast %23 : vector<16xf32> to vector<16x1xf32>
    %cst_12 = arith.constant dense<0.000000e+00> : vector<16xf32>
    %25 = vector.multi_reduction <add>, %3, %cst_12 [1] : vector<16x256xf32> to vector<16xf32>
    %26 = vector.shape_cast %25 : vector<16xf32> to vector<16x1xf32>
    %27 = arith.mulf %0, %0 : vector<16x256xf32>
    %cst_13 = arith.constant dense<0.000000e+00> : vector<16xf32>
    %28 = vector.multi_reduction <add>, %27, %cst_13 [1] : vector<16x256xf32> to vector<16xf32>
    %29 = vector.shape_cast %28 : vector<16xf32> to vector<16x1xf32>
    %30 = arith.mulf %1, %1 : vector<16x256xf32>
    %cst_14 = arith.constant dense<0.000000e+00> : vector<16xf32>
    %31 = vector.multi_reduction <add>, %30, %cst_14 [1] : vector<16x256xf32> to vector<16xf32>
    %32 = vector.shape_cast %31 : vector<16xf32> to vector<16x1xf32>
    %33 = arith.mulf %9, %11 : vector<16x1xf32>
    %34 = arith.subf %14, %33 : vector<16x1xf32>
    %35 = arith.mulf %11, %9 : vector<16x1xf32>
    %36 = arith.subf %34, %35 : vector<16x1xf32>
    %37 = arith.mulf %9, %11 : vector<16x1xf32>
    %38 = arith.mulf %37, %7 : vector<16x1xf32>
    %39 = arith.addf %36, %38 : vector<16x1xf32>
    %cst_15 = arith.constant 2.000000e+00 : f32
    %40 = vector.broadcast %cst_15 : f32 to vector<16x1xf32>
    %41 = arith.mulf %40, %9 : vector<16x1xf32>
    %42 = arith.mulf %41, %9 : vector<16x1xf32>
    %43 = arith.subf %17, %42 : vector<16x1xf32>
    %44 = arith.mulf %9, %9 : vector<16x1xf32>
    %45 = arith.mulf %44, %7 : vector<16x1xf32>
    %46 = arith.addf %43, %45 : vector<16x1xf32>
    %cst_16 = arith.constant 2.000000e+00 : f32
    %47 = vector.broadcast %cst_16 : f32 to vector<16x1xf32>
    %48 = arith.mulf %47, %11 : vector<16x1xf32>
    %49 = arith.mulf %48, %11 : vector<16x1xf32>
    %50 = arith.subf %20, %49 : vector<16x1xf32>
    %51 = arith.mulf %11, %11 : vector<16x1xf32>
    %52 = arith.mulf %51, %7 : vector<16x1xf32>
    %53 = arith.addf %50, %52 : vector<16x1xf32>
    %54 = arith.mulf %46, %53 : vector<16x1xf32>
    %55 = math.rsqrt %54 : vector<16x1xf32>
    %56 = arith.mulf %39, %55 : vector<16x1xf32>
    %c0_17 = arith.constant 0 : index
    %c0_18 = arith.constant 0 : index
    %57 = vector.load %arg4[%c0_17, %c0_18] : memref<16x1xf32, #tpu.memory_space<vmem>>, vector<16x1xf32>
    tpu.vector_store %arg4[%c0_17, %c0_18], %56 {strides = array<i32>} : memref<16x1xf32, #tpu.memory_space<vmem>>, vector<16x1xf32>,
    %cst_19 = arith.constant 2.560000e+02 : f32
    %cst_20 = arith.constant 1.000000e+00 : f32
    %58 = arith.subf %cst_19, %cst_20 : f32
    %cst_21 = arith.constant 2.560000e+02 : f32
    %59 = arith.divf %58, %cst_21 : f32
    %cst_22 = arith.constant 2.560000e+02 : f32
    %60 = vector.broadcast %cst_22 : f32 to vector<16x1xf32>
    %61 = arith.divf %22, %60 : vector<16x1xf32>
    %cst_23 = arith.constant 2.560000e+02 : f32
    %62 = vector.broadcast %cst_23 : f32 to vector<16x1xf32>
    %63 = arith.divf %24, %62 : vector<16x1xf32>
    %cst_24 = arith.constant 2.560000e+02 : f32
    %64 = vector.broadcast %cst_24 : f32 to vector<16x1xf32>
    %65 = arith.mulf %64, %61 : vector<16x1xf32>
    %66 = arith.mulf %65, %63 : vector<16x1xf32>
    %67 = arith.subf %26, %66 : vector<16x1xf32>
    %cst_25 = arith.constant 2.560000e+02 : f32
    %68 = vector.broadcast %cst_25 : f32 to vector<16x1xf32>
    %69 = arith.divf %67, %68 : vector<16x1xf32>
    %cst_26 = arith.constant 2.560000e+02 : f32
    %70 = vector.broadcast %cst_26 : f32 to vector<16x1xf32>
    %71 = arith.mulf %70, %61 : vector<16x1xf32>
    %72 = arith.mulf %71, %61 : vector<16x1xf32>
    %73 = arith.subf %29, %72 : vector<16x1xf32>
    %cst_27 = arith.constant 2.560000e+02 : f32
    %cst_28 = arith.constant 1.000000e+00 : f32
    %74 = arith.subf %cst_27, %cst_28 : f32
    %75 = vector.broadcast %74 : f32 to vector<16x1xf32>
    %76 = arith.divf %73, %75 : vector<16x1xf32>
    %cst_29 = arith.constant 2.560000e+02 : f32
    %77 = vector.broadcast %cst_29 : f32 to vector<16x1xf32>
    %78 = arith.mulf %77, %63 : vector<16x1xf32>
    %79 = arith.mulf %78, %63 : vector<16x1xf32>
    %80 = arith.subf %32, %79 : vector<16x1xf32>
    %cst_30 = arith.constant 2.560000e+02 : f32
    %cst_31 = arith.constant 1.000000e+00 : f32
    %81 = arith.subf %cst_30, %cst_31 : f32
    %82 = vector.broadcast %81 : f32 to vector<16x1xf32>
    %83 = arith.divf %80, %82 : vector<16x1xf32>
    %84 = arith.mulf %76, %83 : vector<16x1xf32>
    %85 = math.sqrt %84 : vector<16x1xf32>
    %86 = vector.broadcast %59 : f32 to vector<16x1xf32>
    %87 = arith.mulf %85, %86 : vector<16x1xf32>
    %88 = arith.divf %69, %87 : vector<16x1xf32>
    %c0_32 = arith.constant 0 : index
    %c0_33 = arith.constant 0 : index
    %89 = vector.load %arg5[%c0_32, %c0_33] : memref<16x1xf32, #tpu.memory_space<vmem>>, vector<16x1xf32>
    tpu.vector_store %arg5[%c0_32, %c0_33], %88 {strides = array<i32>} : memref<16x1xf32, #tpu.memory_space<vmem>>, vector<16x1xf32>,
    return
  }
  func.func @transform_0(%arg0: i32) -> (i32, i32) {
    %c0_i32 = arith.constant 0 : i32
    %c0_i32_0 = arith.constant 0 : i32
    return %arg0, %c0_i32 : i32, i32
  }
  func.func @transform_1(%arg0: i32) -> (i32, i32) {
    %c0_i32 = arith.constant 0 : i32
    %c0_i32_0 = arith.constant 0 : i32
    return %arg0, %c0_i32 : i32, i32
  }
  func.func @transform_2(%arg0: i32) -> (i32, i32) {
    %c0_i32 = arith.constant 0 : i32
    %c0_i32_0 = arith.constant 0 : i32
    return %arg0, %c0_i32 : i32, i32
  }
  func.func @transform_3(%arg0: i32) -> (i32, i32) {
    %c0_i32 = arith.constant 0 : i32
    %c0_i32_0 = arith.constant 0 : i32
    return %arg0, %c0_i32 : i32, i32
  }
  func.func @transform_4(%arg0: i32) -> (i32, i32) {
    %c0_i32 = arith.constant 0 : i32
    %c0_i32_0 = arith.constant 0 : i32
    return %arg0, %c0_i32 : i32, i32
  }
}

</mosaic_0001>

<bundles_post_ra>
// kernel: tpu_custom_call.1
= control target key start
LH: loop header
LB: loop body
LE: loop exit
PB: predicated region body
PF: predicated region fallthrough
CT: control target
= control target key end

     0   :  { %10 = vsyncpa [#allocation3], 0  ;;  %s517_s0 = inlined_call_operand.hbm [shape: f32[10,256], index: 0, kind: input, shape index: {}]   ;;  %s518_s1 = inlined_call_operand.hbm [shape: f32[10,256], index: 1, kind: input, shape index: {}]   ;;  %s519_s2 = inlined_call_operand.hbm [shape: f32[10,256], index: 2, kind: input, shape index: {}]   ;;  %s520_s3 = inlined_call_operand.vmem [shape: f32[16,1], index: 3, kind: output, shape index: {0}]   ;;  %s521_s4 = inlined_call_operand.vmem [shape: f32[16,1], index: 4, kind: output, shape index: {1}]  }
   0x1   :  { %11 = vsyncpa [#allocation5], 0  ;;  %s359_s15 = smov [#allocation4]   ;;  %s360_s17 = smov [#allocation2]  }
   0x2   :  { %s29_s16 = sshll.u32 %s359_s15, 4  ;;  %s17_s18 = sshll.u32 %s360_s17, 4  ;;  %s30_s16 = int_to_ptr.vmem [resolvable:$true] %s29_s16  ;;  %s389_s18 = int_to_ptr.vmem [resolvable:$true] %s17_s18 }
   0x3   :  { %s289_s21 = scalar_lea.hbm %s518_s1, 512 }
   0x4   :  { %p290_p0 = scmp.ne.s32.totalorder %s518_s1, %s289_s21  ;;  %p293_p1 = scmp.lt.u32.totalorder %s289_s21, %s518_s1 }
   0x6   :  { %p295_p2 = pnand %p293_p1, %p290_p0 }
   0x8   :  { %298 = shalt.err (!%p295_p2)
}
   0x9   :  { %s299_s26 = scalar_lea.vmem %s30_s16, 512  ;;  %p304_p4 = scmp.lt.s32.totalorder %s30_s16, %s30_s16 }
   0xa   :  { %p300_p3 = scmp.ne.s32.totalorder %s30_s16, %s299_s26  ;;  %p305_p5 = scmp.lt.s32.totalorder %s299_s26, %s299_s26 }
   0xc   :  { %p306_p6 = por %p305_p5, %p304_p4 }
   0xe   :  { %p307_p7 = pnand %p306_p6, %p300_p3 }
  0x10   :  { %310 = shalt.err (!%p307_p7)
}
  0x11   :  { %s361_s27 = smov 256   ;;  %s362_s28 = smov 16  }
  0x12   :  { %35 = dma.hbm_to_vmem [thread:$0]  %s518_s1, 512, %s30_s16, [#allocation5], %s361_s27, %s361_s27, %s362_s28  }
  0x13   :  { %s311_s7 = scalar_lea.hbm %s517_s0, 512 }
  0x14   :  { %p312_p8 = scmp.ne.s32.totalorder %s517_s0, %s311_s7  ;;  %p315_p9 = scmp.lt.u32.totalorder %s311_s7, %s517_s0 }
  0x16   :  { %p317_p10 = pnand %p315_p9, %p312_p8 }
  0x18   :  { %320 = shalt.err (!%p317_p10)
}
  0x19   :  { %s321_s12 = scalar_lea.vmem %s389_s18, 512  ;;  %p326_p12 = scmp.lt.s32.totalorder %s389_s18, %s389_s18 }
  0x1a   :  { %p322_p11 = scmp.ne.s32.totalorder %s389_s18, %s321_s12  ;;  %p327_p13 = scmp.lt.s32.totalorder %s321_s12, %s321_s12 }
  0x1c   :  { %p328_p0 = por %p327_p13, %p326_p12 }
  0x1e   :  { %p329_p1 = pnand %p328_p0, %p322_p11 }
  0x20   :  { %332 = shalt.err (!%p329_p1)
}
  0x21   :  { %23 = dma.hbm_to_vmem [thread:$0]  %s517_s0, 512, %s389_s18, [#allocation3], %s361_s27, %s361_s27, %s362_s28  }
  0x22   :  { %s363_s14 = smov [#allocation6]   ;;  %s333_s19 = scalar_lea.hbm %s519_s2, 512 }
  0x23   :  { %s41_s15 = sshll.u32 %s363_s14, 4  ;;  %p334_p2 = scmp.ne.s32.totalorder %s519_s2, %s333_s19  ;;  %s42_s15 = int_to_ptr.vmem [resolvable:$true] %s41_s15 }
  0x24   :  { %p337_p3 = scmp.lt.u32.totalorder %s333_s19, %s519_s2 }
  0x26   :  { %p339_p4 = pnand %p337_p3, %p334_p2 }
  0x28   :  { %342 = shalt.err (!%p339_p4)
}
  0x29   :  { %s343_s24 = scalar_lea.vmem %s42_s15, 512  ;;  %p348_p6 = scmp.lt.s32.totalorder %s42_s15, %s42_s15 }
  0x2a   :  { %p344_p5 = scmp.ne.s32.totalorder %s42_s15, %s343_s24  ;;  %p349_p7 = scmp.lt.s32.totalorder %s343_s24, %s343_s24 }
  0x2c   :  { %p350_p8 = por %p349_p7, %p348_p6 }
  0x2e   :  { %p351_p9 = pnand %p350_p8, %p344_p5 }
  0x30   :  { %354 = shalt.err (!%p351_p9)
}
  0x31   :  { %47 = dma.hbm_to_vmem [thread:$0]  %s519_s2, 512, %s42_s15, [#allocation5], %s361_s27, %s361_s27, %s362_s28  }
  0x32   :  { %355 = dma.done.wait [#allocation3], 512  }
  0x33   :  { %356 = vsyncadd [#allocation3], 4294966784 }
  0x34   :  { %357 = dma.done.wait [#allocation5], 1024  }
  0x35   :  { %358 = vsyncadd [#allocation5], 4294966272  ;;  %v441_v0 = vld [vmem:[#allocation4] sm:$0xff]  ;;  %v443_v1 = vld [vmem:[#allocation4 + $0x8] sm:$0xff]  ;;  %vm207_vm4 = vcmask 7168  }
  0x36   :  { %v445_v2 = vld [vmem:[#allocation2] sm:$0xff]  ;;  %v135_v3 = vadd.f32 %v443_v1, %v441_v0  ;;  %v449_v4 = vld [vmem:[#allocation2 + $0x8] sm:$0xff]  ;;  %v63_v5 = vld [vmem:[#allocation4 + $0x10] sm:$0xff]  ;;  %v157_v20 = vmul.f32 %v441_v0, %v441_v0  ;;  %v158_v21 = vmul.f32 %v443_v1, %v443_v1 }
  0x37   :  { %v64_v6 = vld [vmem:[#allocation4 + $0x18] sm:$0xff]  ;;  %v129_v7 = vadd.f32 %v449_v4, %v445_v2  ;;  %v59_v8 = vld [vmem:[#allocation2 + $0x10] sm:$0xff]  ;;  %v147_v14 = vmul.f32 %v445_v2, %v445_v2  ;;  %v148_v15 = vmul.f32 %v449_v4, %v449_v4  ;;  %v159_v17 = vmul.f32 %v63_v5, %v63_v5  ;;  %v65_v24 = vld [vmem:[#allocation6] sm:$0xff] }
  0x38   :  { %v60_v9 = vld [vmem:[#allocation2 + $0x18] sm:$0xff]  ;;  %136 = vadd.xlane.f32.xlu1 %v135_v3  ;;  %v138_v10 = vadd.f32 %v64_v6, %v63_v5  ;;  %v149_v11 = vmul.f32 %v59_v8, %v59_v8  ;;  %v160_v18 = vmul.f32 %v64_v6, %v64_v6  ;;  %v67_v22 = vld [vmem:[#allocation6 + $0x10] sm:$0xff]  ;;  %v66_v25 = vld [vmem:[#allocation6 + $0x8] sm:$0xff]  ;;  %v161_v29 = vadd.f32 %v158_v21, %v157_v20 }
  0x39   :  { %v150_v12 = vmul.f32 %v60_v9, %v60_v9  ;;  %130 = vadd.xlane.f32.xlu0 %v129_v7  ;;  %v132_v13 = vadd.f32 %v60_v9, %v59_v8  ;;  %v151_v19 = vadd.f32 %v148_v15, %v147_v14  ;;  %v68_v23 = vld [vmem:[#allocation6 + $0x18] sm:$0xff]  ;;  %v75_v27 = vmul.f32 %v67_v22, %v59_v8 }
  0x3a   :  { %v164_v26 = vadd.f32 %v160_v18, %v159_v17  ;;  %v76_v28 = vmul.f32 %v68_v23, %v60_v9  ;;  %v73_v30 = vmul.f32 %v65_v24, %v445_v2  ;;  %v74_v31 = vmul.f32 %v66_v25, %v449_v4 }
  0x3b   :  { %v154_v16 = vadd.f32 %v150_v12, %v149_v11  ;;  %v79_v33 = vmul.f32 %v67_v22, %v63_v5  ;;  %v80_v34 = vmul.f32 %v68_v23, %v64_v6  ;;  %v77_v36 = vmul.f32 %v65_v24, %v441_v0 }
  0x3c   :  { %139 = vadd.xlane.f32.xlu1 %v138_v10  ;;  %v90_v32 = vadd.f32 %v76_v28, %v75_v27  ;;  %v87_v35 = vadd.f32 %v74_v31, %v73_v30  ;;  %v78_v37 = vmul.f32 %v66_v25, %v443_v1  ;;  %v84_v40 = vadd.f32 %v68_v23, %v67_v22 }
  0x3d   :  { %133 = vadd.xlane.f32.xlu0 %v132_v13  ;;  %v96_v38 = vadd.f32 %v80_v34, %v79_v33  ;;  %v111_v41 = vmul.f32 %v75_v27, %v59_v8  ;;  %v112_v42 = vmul.f32 %v76_v28, %v60_v9  ;;  %v81_v43 = vadd.f32 %v66_v25, %v65_v24 }
  0x3e   :  { %v93_v39 = vadd.f32 %v78_v37, %v77_v36  ;;  %v109_v44 = vmul.f32 %v73_v30, %v445_v2  ;;  %v110_v45 = vmul.f32 %v74_v31, %v449_v4  ;;  %v121_v46 = vmul.f32 %v79_v33, %v63_v5 }
  0x3f   :  { %v122_v47 = vmul.f32 %v80_v34, %v64_v6  ;;  %v116_v48 = vadd.f32 %v112_v42, %v111_v41  ;;  %v119_v49 = vmul.f32 %v77_v36, %v441_v0  ;;  %v71_v50 = vmul.f32 %v63_v5, %v59_v8 }
  0x40   :  { %155 = vadd.xlane.f32.xlu1 %v154_v16  ;;  %v72_v51 = vmul.f32 %v64_v6, %v60_v9  ;;  %v113_v52 = vadd.f32 %v110_v45, %v109_v44  ;;  %v120_v53 = vmul.f32 %v78_v37, %v443_v1  ;;  %v69_v54 = vmul.f32 %v441_v0, %v445_v2 }
  0x41   :  { %152 = vadd.xlane.f32.xlu0 %v151_v19  ;;  %v70_v55 = vmul.f32 %v443_v1, %v449_v4  ;;  %v126_v56 = vadd.f32 %v122_v47, %v121_v46  ;;  %v101_v57 = vmul.f32 %v71_v50, %v67_v22 }
  0x42   :  { %v102_v58 = vmul.f32 %v72_v51, %v68_v23  ;;  %v123_v59 = vadd.f32 %v120_v53, %v119_v49  ;;  %v99_v60 = vmul.f32 %v69_v54, %v65_v24  ;;  %v144_v3 = vadd.f32 %v72_v51, %v71_v50 }
  0x43   :  { %v100_v61 = vmul.f32 %v70_v55, %v66_v25  ;;  %v141_v5 = vadd.f32 %v70_v55, %v69_v54 }
  0x44   :  { %165 = vadd.xlane.f32.xlu1 %v164_v26  ;;  %v106_v62 = vadd.f32 %v102_v58, %v101_v57 }
  0x45   :  { %162 = vadd.xlane.f32.xlu0 %v161_v29  ;;  %v103_v63 = vadd.f32 %v100_v61, %v99_v60 }
  0x48   :  { %91 = vadd.xlane.f32.xlu1 %v90_v32 }
  0x49   :  { %88 = vadd.xlane.f32.xlu0 %v87_v35 }
  0x4c   :  { %97 = vadd.xlane.f32.xlu1 %v96_v38 }
  0x4d   :  { %94 = vadd.xlane.f32.xlu0 %v93_v39 }
  0x50   :  { %85 = vadd.xlane.f32.xlu1 %v84_v40 }
  0x51   :  { %82 = vadd.xlane.f32.xlu0 %v81_v43 }
  0x54   :  { %117 = vadd.xlane.f32.xlu1 %v116_v48 }
  0x55   :  { %114 = vadd.xlane.f32.xlu0 %v113_v52 }
  0x58   :  { %127 = vadd.xlane.f32.xlu1 %v126_v56 }
  0x59   :  { %124 = vadd.xlane.f32.xlu0 %v123_v59 }
  0x5c   :  { %107 = vadd.xlane.f32.xlu1 %v106_v62 }
  0x5d   :  { %104 = vadd.xlane.f32.xlu0 %v103_v63 }
  0x60   :  { %145 = vadd.xlane.f32.xlu1 %v144_v3 }
  0x61   :  { %142 = vadd.xlane.f32.xlu0 %v141_v5 }
  0xc5   :  { %v137_v0 = vpop.xlane.xlu1 %136 }
  0xc6   :  { %v131_v1 = vpop.xlane.xlu0 %130  ;;  %v473_v4 = vmul.f32 0.00390625, %v137_v0 }
  0xc7   :  { %v211_v2 = vmul.f32 0.00390625, %v131_v1 }
  0xc8   :  { %v230_v14 = vmul.f32 256.0, %v473_v4 }
  0xc9   :  { %v140_v6 = vpop.xlane.xlu1 %139  ;;  %v477_v9 = vmul.f32 256.0, %v211_v2 }
  0xca   :  { %v475_v7 = vmul.f32 0.00390625, %v140_v6  ;;  %v134_v8 = vpop.xlane.xlu0 %133  ;;  %v232_v22 = vmul.f32 %v230_v14, %v473_v4 }
  0xcb   :  { %v212_v10 = vmul.f32 0.00390625, %v134_v8  ;;  %v223_v17 = vmul.f32 %v477_v9, %v211_v2 }
  0xcc   :  { %v231_v11 = vmul.f32 256.0, %v475_v7 }
  0xcd   :  { %v480_v12 = vmul.f32 256.0, %v212_v10  ;;  %v156_v13 = vpop.xlane.xlu1 %155 }
  0xce   :  { %v153_v15 = vpop.xlane.xlu0 %152  ;;  %v233_v18 = vmul.f32 %v231_v11, %v475_v7 }
  0xcf   :  { %v224_v16 = vmul.f32 %v480_v12, %v212_v10  ;;  %v225_v20 = vsub.f32 %v153_v15, %v223_v17 }
  0xd1   :  { %v226_v19 = vsub.f32 %v156_v13, %v224_v16  ;;  %v166_v21 = vpop.xlane.xlu1 %165  ;;  %v228_v28 = vmul.f32 0.003921569, %v225_v20 }
  0xd2   :  { %v235_v23 = vsub.f32 %v166_v21, %v233_v18  ;;  %v163_v24 = vpop.xlane.xlu0 %162 }
  0xd3   :  { %v234_v25 = vsub.f32 %v163_v24, %v232_v22  ;;  %v229_v26 = vmul.f32 0.003921569, %v226_v19  ;;  %v218_v24 = vmul.f32 %v480_v12, %v475_v7 }
  0xd4   :  { %v237_v27 = vmul.f32 0.003921569, %v235_v23 }
  0xd5   :  { %v236_v29 = vmul.f32 0.003921569, %v234_v25  ;;  %v92_v30 = vpop.xlane.xlu1 %91 }
  0xd6   :  { %v239_v31 = vmul.f32 %v237_v27, %v229_v26  ;;  %v89_v32 = vpop.xlane.xlu0 %88  ;;  %v178_v37 = vmul.f32 2.0, %v92_v30  ;;  %v184_v40 = vmul.f32 %v92_v30, %v92_v30  ;;  %v217_v27 = vmul.f32 %v477_v9, %v473_v4 }
  0xd7   :  { %v238_v33 = vmul.f32 %v236_v29, %v228_v28  ;;  %v177_v39 = vmul.f32 2.0, %v89_v32  ;;  %v183_v43 = vmul.f32 %v89_v32, %v89_v32 }
  0xd8   :  { %277 = vrsqrt.f32 %v239_v31  ;;  %v180_v44 = vmul.f32 %v178_v37, %v92_v30  ;;  %vm249_vm0 = vcmp.eq.f32.partialorder %v239_v31, inf  ;;  %vm251_vm1 = vcmp.eq.f32.partialorder %v239_v31, 0.0 }
  0xd9   :  { %279 = vrsqrt.f32 %v238_v33  ;;  %v98_v34 = vpop.xlane.xlu1 %97  ;;  %v179_v48 = vmul.f32 %v177_v39, %v89_v32  ;;  %v252_v50 = vand.u32 2147483648, %v239_v31  ;;  %vm242_vm2 = vcmp.eq.f32.partialorder %v238_v33, inf }
  0xda   :  { %v95_v35 = vpop.xlane.xlu0 %94  ;;  %v190_v41 = vmul.f32 2.0, %v98_v34  ;;  %v196_v47 = vmul.f32 %v98_v34, %v98_v34  ;;  %vm244_vm3 = vcmp.eq.f32.partialorder %v238_v33, 0.0  ;;  %v245_v54 = vand.u32 2147483648, %v238_v33 }
  0xdb   :  { %v189_v42 = vmul.f32 2.0, %v95_v35  ;;  %v195_v53 = vmul.f32 %v95_v35, %v95_v35  ;;  %v168_v21 = vmul.f32 %v98_v34, %v92_v30  ;;  %v167_v23 = vmul.f32 %v95_v35, %v89_v32 }
  0xdc   :  { %v192_v57 = vmul.f32 %v190_v41, %v98_v34 }
  0xdd   :  { %v487_v36 = vpop.xlane.xlu1 %85  ;;  %v191_v58 = vmul.f32 %v189_v42, %v95_v35 }
  0xde   :  { %v489_v38 = vpop.xlane.xlu0 %82  ;;  %v186_v59 = vmul.f32 %v184_v40, %v487_v36  ;;  %v198_v60 = vmul.f32 %v196_v47, %v487_v36  ;;  %v174_v32 = vmul.f32 %v168_v21, %v487_v36 }
  0xdf   :  { %v185_v3 = vmul.f32 %v183_v43, %v489_v38  ;;  %v197_v6 = vmul.f32 %v195_v53, %v489_v38  ;;  %v173_v7 = vmul.f32 %v167_v23, %v489_v38 }
  0xe1   :  { %v118_v45 = vpop.xlane.xlu1 %117 }
  0xe2   :  { %v278_v46 = vpop.eup %277  ;;  %v115_v49 = vpop.xlane.xlu0 %114  ;;  %v182_v56 = vsub.f32 %v118_v45, %v180_v44 }
  0xe3   :  { %v280_v51 = vpop.eup %279  ;;  %v248_v52 = vmul.f32 %v278_v46, %v239_v31  ;;  %v181_v61 = vsub.f32 %v115_v49, %v179_v48 }
  0xe4   :  { %v241_v55 = vmul.f32 %v280_v51, %v238_v33  ;;  %v188_v13 = vadd.f32 %v186_v59, %v182_v56 }
  0xe5   :  { %v128_v62 = vpop.xlane.xlu1 %127  ;;  %v250_v63 = vsel %vm249_vm0, %v239_v31, %v248_v52  ;;  %v187_v16 = vadd.f32 %v185_v3, %v181_v61 }
  0xe6   :  { %v194_v5 = vsub.f32 %v128_v62, %v192_v57  ;;  %v125_v0 = vpop.xlane.xlu0 %124  ;;  %v253_v1 = vsel %vm251_vm1, %v252_v50, %v250_v63  ;;  %v243_v2 = vsel %vm242_vm2, %v238_v33, %v241_v55 }
  0xe7   :  { %v193_v8 = vsub.f32 %v125_v0, %v191_v58  ;;  %v255_v10 = vmul.f32 0.99609375, %v253_v1  ;;  %v246_v11 = vsel %vm244_vm3, %v245_v54, %v243_v2 }
  0xe8   :  { %v200_v14 = vadd.f32 %v198_v60, %v194_v5  ;;  %v254_v15 = vmul.f32 0.99609375, %v246_v11 }
  0xe9   :  { %v199_v17 = vadd.f32 %v197_v6, %v193_v8  ;;  %v108_v18 = vpop.xlane.xlu1 %107  ;;  %281 = vrcp.f32 %v255_v10 }
  0xea   :  { %v202_v19 = vmul.f32 %v200_v14, %v188_v13  ;;  %v105_v20 = vpop.xlane.xlu0 %104  ;;  %283 = vrcp.f32 %v254_v15  ;;  %v170_v25 = vsub.f32 %v108_v18, %v168_v21 }
  0xeb   :  { %v201_v22 = vmul.f32 %v199_v17, %v187_v16  ;;  %v169_v28 = vsub.f32 %v105_v20, %v167_v23 }
  0xec   :  { %285 = vrsqrt.f32 %v202_v19  ;;  %v172_v37 = vsub.f32 %v170_v25, %v168_v21 }
  0xed   :  { %287 = vrsqrt.f32 %v201_v22  ;;  %v146_v26 = vpop.xlane.xlu1 %145  ;;  %v171_v39 = vsub.f32 %v169_v28, %v167_v23 }
  0xee   :  { %v220_v29 = vsub.f32 %v146_v26, %v218_v24  ;;  %v143_v31 = vpop.xlane.xlu0 %142  ;;  %v176_v41 = vadd.f32 %v174_v32, %v172_v37 }
  0xef   :  { %v219_v33 = vsub.f32 %v143_v31, %v217_v27  ;;  %v175_v4 = vadd.f32 %v173_v7, %v171_v39 }
  0xf0   :  { %v222_v40 = vmul.f32 0.00390625, %v220_v29 }
  0xf1   :  { %v221_v34 = vmul.f32 0.00390625, %v219_v33 }
  0xf3   :  { %v282_v30 = vpop.eup %281 }
  0xf4   :  { %v284_v35 = vpop.eup %283  ;;  %v259_v12 = vmul.f32 %v282_v30, %v222_v40 }
  0xf5   :  { %v257_v42 = vmul.f32 %v284_v35, %v221_v34 }
  0xf6   :  { %v286_v43 = vpop.eup %285  ;;  %261 = vst.msk [vmem:[%s521_s4 + $0x8] sm:$0xff] %vm207_vm4, %v259_v12 }
  0xf7   :  { %v288_v9 = vpop.eup %287  ;;  %v206_v44 = vmul.f32 %v286_v43, %v176_v41  ;;  %260 = vst.msk [vmem:[%s521_s4] sm:$0xff] %vm207_vm4, %v257_v42 }
  0xf8   :  { %v205_v36 = vmul.f32 %v288_v9, %v175_v4 }
  0xf9   :  { %209 = vst.msk [vmem:[%s520_s3 + $0x8] sm:$0xff] %vm207_vm4, %v206_v44 }
  0xfa   :  { %208 = vst.msk [vmem:[%s520_s3] sm:$0xff] %vm207_vm4, %v205_v36 }
  0xfb   :  { %270 = vsyncpa [#allocation3], 1 }
  0xfc   :  { %271 = vsyncpa [#allocation5], 1 }

</bundles_post_ra>
